<compile_context>
chip_gen: v7x
topology: tpu7x:2x2x1
jax: 0.10.0
libtpu: 0.0.40
codegen_flags: <defaults>
</compile_context>

<pallas_src>
import functools

import numpy as np
import jax
import jax.numpy as jnp
from jax import lax
from jax.experimental import pallas as pl
from jax.experimental.pallas import tpu as pltpu


def _round_up(v, m):
    return ((v + m - 1) // m) * m


def _cdiv(a, b):
    return -(-a // b)


def _vmem_capacity_bytes():
    """Physical per-core VMEM; conservative fallback if the query is unavailable."""
    try:
        info = pltpu.get_tpu_info()
        cap = getattr(info, "vmem_capacity_bytes", None)
        if cap:
            return int(cap)
    except Exception:
        pass
    return 64 * 1024 * 1024  # v7x per-TC size (smallest of the supported gens)


def sae_forward_kernel(x_ref, w_encT_ref, b_enc_ref, w_dec_ref, b_dec_ref,
                       recon_ref, err_ref, *, k, batch, block_b):
    i = pl.program_id(0)
    last = pl.num_programs(0) - 1

    x = x_ref[...]                                   # [TB, Dp] f32

    # Encoder (MXU).  The b_dec pre-subtraction is folded into b_enc on the
    # host, so x feeds the matmul directly (x is still needed raw for fvu).
    pre = jnp.dot(x.astype(w_encT_ref.dtype), w_encT_ref[...],
                  preferred_element_type=jnp.float32)
    pre = jnp.maximum(pre + b_enc_ref[...], 0.0)     # ReLU -> pre >= 0

    # --- exact top-k, one XLU reduction per iteration -----------------------
    # Each iteration selects the current row maximum of `remaining` (exact f32
    # value written, no truncation), then knocks those positions out.  The
    # (m > 0) guard keeps fully-exhausted / all-zero rows from being
    # overwritten; zero-valued selections contribute nothing to recon anyway.
    def topk_body(_, carry):
        z, rem = carry
        m = jnp.max(rem, axis=-1, keepdims=True)         # [TB, 1] single reduce
        hit = rem == m                                    # exact-equality hits
        z = jnp.where(hit & (m > 0.0), m, z)              # write exact max value
        rem = jnp.where(hit, -jnp.inf, rem)               # knock out
        return z, rem

    z, _ = lax.fori_loop(0, k, topk_body,
                         (jnp.zeros_like(pre), pre), unroll=True)

    # Decoder (MXU)
    recon = jnp.dot(z.astype(w_dec_ref.dtype), w_dec_ref[...],
                    preferred_element_type=jnp.float32) + b_dec_ref[...]
    recon_ref[...] = recon

    # fvu numerator partial for this tile: interior tiles take the unmasked
    # fast path; only the tail tile masks out batch padding rows.
    @pl.when(i != last)
    def _():
        e = recon - x
        err_ref[...] = jnp.broadcast_to(jnp.sum(e * e), err_ref.shape)

    @pl.when(i == last)
    def _():
        row = lax.broadcasted_iota(jnp.int32, (recon.shape[0], 1), 0)
        valid = ((i * block_b + row) < batch).astype(jnp.float32)
        e = (recon - x) * valid
        err_ref[...] = jnp.broadcast_to(jnp.sum(e * e), err_ref.shape)


def sae_forward(x, w_enc, b_enc, w_dec, b_dec, *, k, block_b=None,
                weights_dtype=jnp.float32):
    """x: [B, D]; w_enc/w_dec: [H, D]; b_enc: [H]; b_dec: [D]. Returns (recon, fvu)."""
    B, D = x.shape
    H = w_enc.shape[0]
    f32 = jnp.float32

    # Lane-dense padding of the feature dims (zero padding is value-preserving
    # for this forward).  128 is native on all generations; on v6e/v7x the MXU
    # is 2x256 wide, so rounding D/H to 256 can improve per-pass occupancy when
    # they fall between 128-multiples (not done here to avoid extra padded work).
    Dp = _round_up(D, 128)
    Hp = _round_up(H, 128)

    # --- generation-aware VMEM budget ---------------------------------------
    vmem_cap = _vmem_capacity_bytes()
    vmem_budget = int(vmem_cap * 0.80)        # ~52 MiB on v7x, ~104 MiB on v5e/v6e

    itemsize_w = jnp.dtype(weights_dtype).itemsize
    weight_bytes = 2 * Dp * Hp * itemsize_w + (Hp + Dp) * 4
    # Per batch row: double-buffered x + recon pipeline blocks, plus ~4 [*,Hp]
    # f32 temporaries in the top-k loop (z / remaining carries + intermediates).
    row_bytes = 2 * (Dp + Dp) * 4 + 4 * Hp * 4
    avail = vmem_budget - weight_bytes - (6 << 20)   # margin for compiler scratch
    tb_cap = max(8, (avail // row_bytes) // 8 * 8)

    # --- batch tiling ---------------------------------------------------------
    if block_b is None:
        block_b = 256 if vmem_cap > (64 << 20) else 128   # v5e/v6e vs v7x default
    TB = int(min(block_b, tb_cap, _round_up(B, 8)))
    TB = max(8, (TB // 8) * 8)
    G = _cdiv(B, TB)
    # Megacore (v7x has 2 TCs): keep >= 2 and preferably even grid steps so the
    # "parallel" batch axis splits evenly across both cores.
    if G == 1 and B > 8:
        TB = max(8, _round_up(_cdiv(B, 2), 8))
        G = _cdiv(B, TB)
    elif G > 1 and G % 2 == 1:
        TB2 = max(8, _round_up(_cdiv(B, G + 1), 8))
        if _cdiv(B, TB2) == G + 1:
            TB, G = TB2, G + 1
    Bp = G * TB

    # --- host-side operand prep ----------------------------------------------
    xp = jnp.zeros((Bp, Dp), f32).at[:B, :D].set(x.astype(f32))
    # W_enc pre-transposed to [D, H] so both matmuls contract over the RHS
    # sublane dim (native MXU layout, no XLU transpose in-kernel).
    w_encT = jnp.zeros((Dp, Hp), f32).at[:D, :H].set(
        w_enc.T.astype(f32)).astype(weights_dtype)
    w_dec_p = jnp.zeros((Hp, Dp), f32).at[:H, :D].set(
        w_dec.astype(f32)).astype(weights_dtype)
    # Fold the b_dec pre-subtraction into the encoder bias:
    #   (x - b_dec) @ W_enc.T + b_enc == x @ W_enc.T + (b_enc - W_enc @ b_dec)
    b_enc_eff = b_enc.astype(f32) - w_enc.astype(f32) @ b_dec.astype(f32)
    b_enc_p = jnp.zeros((1, Hp), f32).at[0, :H].set(b_enc_eff)
    b_dec_p = jnp.zeros((1, Dp), f32).at[0, :D].set(b_dec.astype(f32))

    est = weight_bytes + TB * row_bytes + 2 * 8 * 128 * 4 + (4 << 20)
    vmem_limit = int(min(max(est, 32 << 20), vmem_budget))

    kernel = functools.partial(sae_forward_kernel, k=k, batch=B, block_b=TB)

    recon_p, err_parts = pl.pallas_call(
        kernel,
        out_shape=(jax.ShapeDtypeStruct((Bp, Dp), f32),
                   jax.ShapeDtypeStruct((G, 8, 128), f32)),
        grid=(G,),
        in_specs=[
            pl.BlockSpec((TB, Dp), lambda i: (i, 0)),                  # x (pipelined)
            pl.BlockSpec(memory_space=pltpu.MemorySpace.VMEM),         # W_enc^T resident
            pl.BlockSpec(memory_space=pltpu.MemorySpace.VMEM),         # b_enc' resident
            pl.BlockSpec(memory_space=pltpu.MemorySpace.VMEM),         # W_dec resident
            pl.BlockSpec(memory_space=pltpu.MemorySpace.VMEM),         # b_dec resident
        ],
        out_specs=(pl.BlockSpec((TB, Dp), lambda i: (i, 0)),           # recon
                   pl.BlockSpec((1, 8, 128), lambda i: (i, 0, 0))),    # err^2 partials
        compiler_params=pltpu.CompilerParams(
            dimension_semantics=("parallel",),
            vmem_limit_bytes=vmem_limit),
    )(xp, w_encT, b_enc_p, w_dec_p, b_dec_p)

    recon = recon_p[:B, :D]

    # fvu finalize.  Numerator: tiny cross-tile sum of per-tile partials
    # (keeps the batch grid axis fully parallel).  Denominator: centered
    # two-pass formula on x (numerically stable, matches the reference).
    err2 = jnp.sum(err_parts[:, 0, 0])
    xf = x.astype(f32)
    total_var = jnp.sum((xf - jnp.mean(xf, axis=0, keepdims=True)) ** 2)
    fvu = err2 / total_var
    return recon, fvu


def sae_reference(x, w_enc, b_enc, w_dec, b_dec, k):
    """Pure-JAX reference mirroring the PyTorch forward."""
    sae_in = x - b_dec
    pre = sae_in @ w_enc.T + b_enc
    pre = jnp.maximum(pre, 0.0)
    vals, idxs = jax.lax.top_k(pre, k)
    z = jnp.zeros_like(pre)
    z = z.at[jnp.arange(x.shape[0])[:, None], idxs].set(vals)
    recon = z @ w_dec + b_dec
    e = recon - x
    total_var = jnp.sum((x - x.mean(0)) ** 2)
    fvu = jnp.sum(e ** 2) / total_var
    return recon, fvu


if __name__ == "__main__":
    # small shapes consistent with the module: d_in=32, scale_size=4 -> H=128, k=8
    B, D, SCALE, K = 50, 32, 4, 8
    H = D * SCALE

    key = jax.random.PRNGKey(0)
    k_w, k_x, k_b = jax.random.split(key, 3)

    # deterministic parameter init (mirrors nn.Linear init + SAE __init__)
    bound = 1.0 / np.sqrt(D)
    w_enc = jax.random.uniform(k_w, (H, D), jnp.float32, -bound, bound)
    b_enc = jnp.zeros((H,), jnp.float32)                  # encoder.bias.data.zero_()
    eps = jnp.finfo(jnp.float32).eps
    # W_dec = encoder.weight.clone(); set_decoder_norm_to_unit_norm()
    w_dec = w_enc / (jnp.linalg.norm(w_enc, axis=1, keepdims=True) + eps)
    # b_dec is zero-initialized in the module but learnable; use a small nonzero
    # value here so the folded-bias encoder path is actually exercised.
    b_dec = 0.05 * jax.random.normal(k_b, (D,), jnp.float32)

    x = jax.random.normal(k_x, (B, D), jnp.float32)

    # block_b=32 -> grid of 2 steps (even), with a 14-row padded tail tile,
    # exercising the pipeline, the tail mask and the megacore-friendly grid.
    recon, fvu = sae_forward(x, w_enc, b_enc, w_dec, b_dec, k=K, block_b=32)
    recon = jax.block_until_ready(recon)
    fvu = jax.block_until_ready(fvu)

    recon_ref, fvu_ref = sae_reference(x, w_enc, b_enc, w_dec, b_dec, K)
    np.testing.assert_allclose(np.asarray(recon), np.asarray(recon_ref),
                               rtol=1e-5, atol=1e-5)
    np.testing.assert_allclose(float(fvu), float(fvu_ref), rtol=1e-4, atol=1e-6)

    print("KERNEL_OK")
</pallas_src>

<mosaic_0001>
module attributes {stable_mosaic.version = 11 : i64} {
  func.func @sae_forward_kernel(%arg0: i32, %arg1: memref<32x128xf32, #tpu.memory_space<vmem>>, %arg2: memref<128x128xf32, #tpu.memory_space<vmem>>, %arg3: memref<1x128xf32, #tpu.memory_space<vmem>>, %arg4: memref<128x128xf32, #tpu.memory_space<vmem>>, %arg5: memref<1x128xf32, #tpu.memory_space<vmem>>, %arg6: memref<32x128xf32, #tpu.memory_space<vmem>>, %arg7: memref<1x8x128xf32, #tpu.memory_space<vmem>>) attributes {dimension_semantics = [#tpu.dimension_semantics<parallel>], iteration_bounds = array<i64: 2>, scalar_prefetch = 0 : i64, scratch_operands = 0 : i64, tpu.core_type = #tpu.core_type<tc>, window_params = [{transform_indices = @transform_0, window_bounds = array<i64: 32, 128>}, {pipeline_mode = #tpu.pipeline_mode<synchronous>, transform_indices = @transform_1, window_bounds = array<i64: 128, 128>}, {pipeline_mode = #tpu.pipeline_mode<synchronous>, transform_indices = @transform_2, window_bounds = array<i64: 1, 128>}, {pipeline_mode = #tpu.pipeline_mode<synchronous>, transform_indices = @transform_3, window_bounds = array<i64: 128, 128>}, {pipeline_mode = #tpu.pipeline_mode<synchronous>, transform_indices = @transform_4, window_bounds = array<i64: 1, 128>}, {transform_indices = @transform_5, window_bounds = array<i64: 32, 128>}, {transform_indices = @transform_6, window_bounds = array<i64: 1, 8, 128>}]} {
    %c0 = arith.constant 0 : index
    %c0_0 = arith.constant 0 : index
    %0 = vector.load %arg1[%c0, %c0_0] : memref<32x128xf32, #tpu.memory_space<vmem>>, vector<32x128xf32>
    %c0_1 = arith.constant 0 : index
    %c0_2 = arith.constant 0 : index
    %1 = vector.load %arg2[%c0_1, %c0_2] : memref<128x128xf32, #tpu.memory_space<vmem>>, vector<128x128xf32>
    %cst = arith.constant dense<0.000000e+00> : vector<32x128xf32>
    %2 = tpu.matmul %0, %1, %cst {dimension_numbers = #tpu.dot_dimension_numbers<[1], [0], [0], [1], [0, 0, 1, 1], [], []>} : vector<32x128xf32>, vector<128x128xf32>, vector<32x128xf32> -> vector<32x128xf32>
    %c0_3 = arith.constant 0 : index
    %c0_4 = arith.constant 0 : index
    %3 = vector.load %arg3[%c0_3, %c0_4] : memref<1x128xf32, #tpu.memory_space<vmem>>, vector<1x128xf32>
    %4 = vector.broadcast %3 : vector<1x128xf32> to vector<32x128xf32>
    %5 = arith.addf %2, %4 : vector<32x128xf32>
    %cst_5 = arith.constant 0.000000e+00 : f32
    %6 = vector.broadcast %cst_5 : f32 to vector<32x128xf32>
    %7 = arith.maximumf %5, %6 : vector<32x128xf32>
    %cst_6 = arith.constant 0.000000e+00 : f32
    %8 = vector.broadcast %cst_6 : f32 to vector<32x128xf32>
    %c0_i32 = arith.constant 0 : i32
    %cst_7 = arith.constant dense<0xFF800000> : vector<32xf32>
    %9 = vector.multi_reduction <maximumf>, %7, %cst_7 [1] : vector<32x128xf32> to vector<32xf32>
    %10 = vector.shape_cast %9 : vector<32xf32> to vector<32x1xf32>
    %11 = vector.broadcast %10 : vector<32x1xf32> to vector<32x128xf32>
    %12 = arith.cmpf oeq, %7, %11 : vector<32x128xf32>
    %cst_8 = arith.constant 0.000000e+00 : f32
    %13 = vector.broadcast %cst_8 : f32 to vector<32x1xf32>
    %14 = arith.cmpf ogt, %10, %13 : vector<32x1xf32>
    %15 = vector.broadcast %14 : vector<32x1xi1> to vector<32x128xi1>
    %16 = arith.andi %12, %15 : vector<32x128xi1>
    %17 = vector.shape_cast %10 : vector<32x1xf32> to vector<32x1xf32>
    %18 = vector.broadcast %17 : vector<32x1xf32> to vector<32x128xf32>
    %19 = arith.select %16, %18, %8 : vector<32x128xi1>, vector<32x128xf32>
    %cst_9 = arith.constant 0xFF800000 : f32
    %20 = vector.broadcast %cst_9 : f32 to vector<32x128xf32>
    %21 = arith.select %12, %20, %7 : vector<32x128xi1>, vector<32x128xf32>
    %c1_i32 = arith.constant 1 : i32
    %cst_10 = arith.constant dense<0xFF800000> : vector<32xf32>
    %22 = vector.multi_reduction <maximumf>, %21, %cst_10 [1] : vector<32x128xf32> to vector<32xf32>
    %23 = vector.shape_cast %22 : vector<32xf32> to vector<32x1xf32>
    %24 = vector.broadcast %23 : vector<32x1xf32> to vector<32x128xf32>
    %25 = arith.cmpf oeq, %21, %24 : vector<32x128xf32>
    %cst_11 = arith.constant 0.000000e+00 : f32
    %26 = vector.broadcast %cst_11 : f32 to vector<32x1xf32>
    %27 = arith.cmpf ogt, %23, %26 : vector<32x1xf32>
    %28 = vector.broadcast %27 : vector<32x1xi1> to vector<32x128xi1>
    %29 = arith.andi %25, %28 : vector<32x128xi1>
    %30 = vector.shape_cast %23 : vector<32x1xf32> to vector<32x1xf32>
    %31 = vector.broadcast %30 : vector<32x1xf32> to vector<32x128xf32>
    %32 = arith.select %29, %31, %19 : vector<32x128xi1>, vector<32x128xf32>
    %cst_12 = arith.constant 0xFF800000 : f32
    %33 = vector.broadcast %cst_12 : f32 to vector<32x128xf32>
    %34 = arith.select %25, %33, %21 : vector<32x128xi1>, vector<32x128xf32>
    %c2_i32 = arith.constant 2 : i32
    %cst_13 = arith.constant dense<0xFF800000> : vector<32xf32>
    %35 = vector.multi_reduction <maximumf>, %34, %cst_13 [1] : vector<32x128xf32> to vector<32xf32>
    %36 = vector.shape_cast %35 : vector<32xf32> to vector<32x1xf32>
    %37 = vector.broadcast %36 : vector<32x1xf32> to vector<32x128xf32>
    %38 = arith.cmpf oeq, %34, %37 : vector<32x128xf32>
    %cst_14 = arith.constant 0.000000e+00 : f32
    %39 = vector.broadcast %cst_14 : f32 to vector<32x1xf32>
    %40 = arith.cmpf ogt, %36, %39 : vector<32x1xf32>
    %41 = vector.broadcast %40 : vector<32x1xi1> to vector<32x128xi1>
    %42 = arith.andi %38, %41 : vector<32x128xi1>
    %43 = vector.shape_cast %36 : vector<32x1xf32> to vector<32x1xf32>
    %44 = vector.broadcast %43 : vector<32x1xf32> to vector<32x128xf32>
    %45 = arith.select %42, %44, %32 : vector<32x128xi1>, vector<32x128xf32>
    %cst_15 = arith.constant 0xFF800000 : f32
    %46 = vector.broadcast %cst_15 : f32 to vector<32x128xf32>
    %47 = arith.select %38, %46, %34 : vector<32x128xi1>, vector<32x128xf32>
    %c3_i32 = arith.constant 3 : i32
    %cst_16 = arith.constant dense<0xFF800000> : vector<32xf32>
    %48 = vector.multi_reduction <maximumf>, %47, %cst_16 [1] : vector<32x128xf32> to vector<32xf32>
    %49 = vector.shape_cast %48 : vector<32xf32> to vector<32x1xf32>
    %50 = vector.broadcast %49 : vector<32x1xf32> to vector<32x128xf32>
    %51 = arith.cmpf oeq, %47, %50 : vector<32x128xf32>
    %cst_17 = arith.constant 0.000000e+00 : f32
    %52 = vector.broadcast %cst_17 : f32 to vector<32x1xf32>
    %53 = arith.cmpf ogt, %49, %52 : vector<32x1xf32>
    %54 = vector.broadcast %53 : vector<32x1xi1> to vector<32x128xi1>
    %55 = arith.andi %51, %54 : vector<32x128xi1>
    %56 = vector.shape_cast %49 : vector<32x1xf32> to vector<32x1xf32>
    %57 = vector.broadcast %56 : vector<32x1xf32> to vector<32x128xf32>
    %58 = arith.select %55, %57, %45 : vector<32x128xi1>, vector<32x128xf32>
    %cst_18 = arith.constant 0xFF800000 : f32
    %59 = vector.broadcast %cst_18 : f32 to vector<32x128xf32>
    %60 = arith.select %51, %59, %47 : vector<32x128xi1>, vector<32x128xf32>
    %c4_i32 = arith.constant 4 : i32
    %cst_19 = arith.constant dense<0xFF800000> : vector<32xf32>
    %61 = vector.multi_reduction <maximumf>, %60, %cst_19 [1] : vector<32x128xf32> to vector<32xf32>
    %62 = vector.shape_cast %61 : vector<32xf32> to vector<32x1xf32>
    %63 = vector.broadcast %62 : vector<32x1xf32> to vector<32x128xf32>
    %64 = arith.cmpf oeq, %60, %63 : vector<32x128xf32>
    %cst_20 = arith.constant 0.000000e+00 : f32
    %65 = vector.broadcast %cst_20 : f32 to vector<32x1xf32>
    %66 = arith.cmpf ogt, %62, %65 : vector<32x1xf32>
    %67 = vector.broadcast %66 : vector<32x1xi1> to vector<32x128xi1>
    %68 = arith.andi %64, %67 : vector<32x128xi1>
    %69 = vector.shape_cast %62 : vector<32x1xf32> to vector<32x1xf32>
    %70 = vector.broadcast %69 : vector<32x1xf32> to vector<32x128xf32>
    %71 = arith.select %68, %70, %58 : vector<32x128xi1>, vector<32x128xf32>
    %cst_21 = arith.constant 0xFF800000 : f32
    %72 = vector.broadcast %cst_21 : f32 to vector<32x128xf32>
    %73 = arith.select %64, %72, %60 : vector<32x128xi1>, vector<32x128xf32>
    %c5_i32 = arith.constant 5 : i32
    %cst_22 = arith.constant dense<0xFF800000> : vector<32xf32>
    %74 = vector.multi_reduction <maximumf>, %73, %cst_22 [1] : vector<32x128xf32> to vector<32xf32>
    %75 = vector.shape_cast %74 : vector<32xf32> to vector<32x1xf32>
    %76 = vector.broadcast %75 : vector<32x1xf32> to vector<32x128xf32>
    %77 = arith.cmpf oeq, %73, %76 : vector<32x128xf32>
    %cst_23 = arith.constant 0.000000e+00 : f32
    %78 = vector.broadcast %cst_23 : f32 to vector<32x1xf32>
    %79 = arith.cmpf ogt, %75, %78 : vector<32x1xf32>
    %80 = vector.broadcast %79 : vector<32x1xi1> to vector<32x128xi1>
    %81 = arith.andi %77, %80 : vector<32x128xi1>
    %82 = vector.shape_cast %75 : vector<32x1xf32> to vector<32x1xf32>
    %83 = vector.broadcast %82 : vector<32x1xf32> to vector<32x128xf32>
    %84 = arith.select %81, %83, %71 : vector<32x128xi1>, vector<32x128xf32>
    %cst_24 = arith.constant 0xFF800000 : f32
    %85 = vector.broadcast %cst_24 : f32 to vector<32x128xf32>
    %86 = arith.select %77, %85, %73 : vector<32x128xi1>, vector<32x128xf32>
    %c6_i32 = arith.constant 6 : i32
    %cst_25 = arith.constant dense<0xFF800000> : vector<32xf32>
    %87 = vector.multi_reduction <maximumf>, %86, %cst_25 [1] : vector<32x128xf32> to vector<32xf32>
    %88 = vector.shape_cast %87 : vector<32xf32> to vector<32x1xf32>
    %89 = vector.broadcast %88 : vector<32x1xf32> to vector<32x128xf32>
    %90 = arith.cmpf oeq, %86, %89 : vector<32x128xf32>
    %cst_26 = arith.constant 0.000000e+00 : f32
    %91 = vector.broadcast %cst_26 : f32 to vector<32x1xf32>
    %92 = arith.cmpf ogt, %88, %91 : vector<32x1xf32>
    %93 = vector.broadcast %92 : vector<32x1xi1> to vector<32x128xi1>
    %94 = arith.andi %90, %93 : vector<32x128xi1>
    %95 = vector.shape_cast %88 : vector<32x1xf32> to vector<32x1xf32>
    %96 = vector.broadcast %95 : vector<32x1xf32> to vector<32x128xf32>
    %97 = arith.select %94, %96, %84 : vector<32x128xi1>, vector<32x128xf32>
    %cst_27 = arith.constant 0xFF800000 : f32
    %98 = vector.broadcast %cst_27 : f32 to vector<32x128xf32>
    %99 = arith.select %90, %98, %86 : vector<32x128xi1>, vector<32x128xf32>
    %c7_i32 = arith.constant 7 : i32
    %cst_28 = arith.constant dense<0xFF800000> : vector<32xf32>
    %100 = vector.multi_reduction <maximumf>, %99, %cst_28 [1] : vector<32x128xf32> to vector<32xf32>
    %101 = vector.shape_cast %100 : vector<32xf32> to vector<32x1xf32>
    %102 = vector.broadcast %101 : vector<32x1xf32> to vector<32x128xf32>
    %103 = arith.cmpf oeq, %99, %102 : vector<32x128xf32>
    %cst_29 = arith.constant 0.000000e+00 : f32
    %104 = vector.broadcast %cst_29 : f32 to vector<32x1xf32>
    %105 = arith.cmpf ogt, %101, %104 : vector<32x1xf32>
    %106 = vector.broadcast %105 : vector<32x1xi1> to vector<32x128xi1>
    %107 = arith.andi %103, %106 : vector<32x128xi1>
    %108 = vector.shape_cast %101 : vector<32x1xf32> to vector<32x1xf32>
    %109 = vector.broadcast %108 : vector<32x1xf32> to vector<32x128xf32>
    %110 = arith.select %107, %109, %97 : vector<32x128xi1>, vector<32x128xf32>
    %cst_30 = arith.constant 0xFF800000 : f32
    %111 = vector.broadcast %cst_30 : f32 to vector<32x128xf32>
    %112 = arith.select %103, %111, %99 : vector<32x128xi1>, vector<32x128xf32>
    %c0_31 = arith.constant 0 : index
    %c0_32 = arith.constant 0 : index
    %113 = vector.load %arg4[%c0_31, %c0_32] : memref<128x128xf32, #tpu.memory_space<vmem>>, vector<128x128xf32>
    %cst_33 = arith.constant dense<0.000000e+00> : vector<32x128xf32>
    %114 = tpu.matmul %110, %113, %cst_33 {dimension_numbers = #tpu.dot_dimension_numbers<[1], [0], [0], [1], [0, 0, 1, 1], [], []>} : vector<32x128xf32>, vector<128x128xf32>, vector<32x128xf32> -> vector<32x128xf32>
    %c0_34 = arith.constant 0 : index
    %c0_35 = arith.constant 0 : index
    %115 = vector.load %arg5[%c0_34, %c0_35] : memref<1x128xf32, #tpu.memory_space<vmem>>, vector<1x128xf32>
    %116 = vector.broadcast %115 : vector<1x128xf32> to vector<32x128xf32>
    %117 = arith.addf %114, %116 : vector<32x128xf32>
    %c0_36 = arith.constant 0 : index
    %c0_37 = arith.constant 0 : index
    %118 = vector.load %arg6[%c0_36, %c0_37] : memref<32x128xf32, #tpu.memory_space<vmem>>, vector<32x128xf32>
    tpu.vector_store %arg6[%c0_36, %c0_37], %117 {strides = array<i32>} : memref<32x128xf32, #tpu.memory_space<vmem>>, vector<32x128xf32>,
    %c1_i32_38 = arith.constant 1 : i32
    %119 = arith.cmpi ne, %arg0, %c1_i32_38 : i32
    %120 = arith.extui %119 : i1 to i32
    %c0_i32_39 = arith.constant 0 : i32
    %121 = arith.cmpi ne, %120, %c0_i32_39 : i32
    scf.if %121 {
      %125 = arith.subf %117, %0 : vector<32x128xf32>
      %126 = arith.mulf %125, %125 : vector<32x128xf32>
      %127 = vector.shape_cast %126 : vector<32x128xf32> to vector<1x32x128xf32>
      %cst_42 = arith.constant dense<0.000000e+00> : vector<1xf32>
      %128 = vector.multi_reduction <add>, %127, %cst_42 [1, 2] : vector<1x32x128xf32> to vector<1xf32>
      %129 = vector.shape_cast %128 : vector<1xf32> to vector<1x1x1xf32>
      %130 = vector.extract %129[0, 0, 0] : f32 from vector<1x1x1xf32>
      %131 = vector.broadcast %130 : f32 to vector<1x8x128xf32>
      %c0_43 = arith.constant 0 : index
      %c0_44 = arith.constant 0 : index
      %c0_45 = arith.constant 0 : index
      %132 = vector.load %arg7[%c0_43, %c0_44, %c0_45] : memref<1x8x128xf32, #tpu.memory_space<vmem>>, vector<1x8x128xf32>
      tpu.vector_store %arg7[%c0_43, %c0_44, %c0_45], %131 {strides = array<i32>} : memref<1x8x128xf32, #tpu.memory_space<vmem>>, vector<1x8x128xf32>,
    } else {
    }
    %c1_i32_40 = arith.constant 1 : i32
    %122 = arith.cmpi eq, %arg0, %c1_i32_40 : i32
    %123 = arith.extui %122 : i1 to i32
    %c0_i32_41 = arith.constant 0 : i32
    %124 = arith.cmpi ne, %123, %c0_i32_41 : i32
    scf.if %124 {
      %125 = tpu.iota {dimensions = array<i32: 0>} : vector<32x1xi32>
      %c32_i32 = arith.constant 32 : i32
      %126 = arith.muli %arg0, %c32_i32 : i32
      %127 = vector.broadcast %126 : i32 to vector<32x1xi32>
      %128 = arith.addi %127, %125 : vector<32x1xi32>
      %c50_i32 = arith.constant 50 : i32
      %129 = vector.broadcast %c50_i32 : i32 to vector<32x1xi32>
      %130 = arith.cmpi slt, %128, %129 : vector<32x1xi32>
      %131 = arith.extui %130 : vector<32x1xi1> to vector<32x1xi32>
      %132 = arith.sitofp %131 : vector<32x1xi32> to vector<32x1xf32>
      %133 = arith.subf %117, %0 : vector<32x128xf32>
      %134 = vector.broadcast %132 : vector<32x1xf32> to vector<32x128xf32>
      %135 = arith.mulf %133, %134 : vector<32x128xf32>
      %136 = arith.mulf %135, %135 : vector<32x128xf32>
      %137 = vector.shape_cast %136 : vector<32x128xf32> to vector<1x32x128xf32>
      %cst_42 = arith.constant dense<0.000000e+00> : vector<1xf32>
      %138 = vector.multi_reduction <add>, %137, %cst_42 [1, 2] : vector<1x32x128xf32> to vector<1xf32>
      %139 = vector.shape_cast %138 : vector<1xf32> to vector<1x1x1xf32>
      %140 = vector.extract %139[0, 0, 0] : f32 from vector<1x1x1xf32>
      %141 = vector.broadcast %140 : f32 to vector<1x8x128xf32>
      %c0_43 = arith.constant 0 : index
      %c0_44 = arith.constant 0 : index
      %c0_45 = arith.constant 0 : index
      %142 = vector.load %arg7[%c0_43, %c0_44, %c0_45] : memref<1x8x128xf32, #tpu.memory_space<vmem>>, vector<1x8x128xf32>
      tpu.vector_store %arg7[%c0_43, %c0_44, %c0_45], %141 {strides = array<i32>} : memref<1x8x128xf32, #tpu.memory_space<vmem>>, vector<1x8x128xf32>,
    } else {
    }
    return
  }
  func.func @transform_0(%arg0: i32) -> (i32, i32) {
    %c0_i32 = arith.constant 0 : i32
    %c0_i32_0 = arith.constant 0 : i32
    return %arg0, %c0_i32 : i32, i32
  }
  func.func @transform_1(%arg0: i32) -> (i32, i32) {
    %c0_i32 = arith.constant 0 : i32
    %c0_i32_0 = arith.constant 0 : i32
    %c0_i32_1 = arith.constant 0 : i32
    return %c0_i32, %c0_i32_0 : i32, i32
  }
  func.func @transform_2(%arg0: i32) -> (i32, i32) {
    %c0_i32 = arith.constant 0 : i32
    %c0_i32_0 = arith.constant 0 : i32
    %c0_i32_1 = arith.constant 0 : i32
    return %c0_i32, %c0_i32_0 : i32, i32
  }
  func.func @transform_3(%arg0: i32) -> (i32, i32) {
    %c0_i32 = arith.constant 0 : i32
    %c0_i32_0 = arith.constant 0 : i32
    %c0_i32_1 = arith.constant 0 : i32
    return %c0_i32, %c0_i32_0 : i32, i32
  }
  func.func @transform_4(%arg0: i32) -> (i32, i32) {
    %c0_i32 = arith.constant 0 : i32
    %c0_i32_0 = arith.constant 0 : i32
    %c0_i32_1 = arith.constant 0 : i32
    return %c0_i32, %c0_i32_0 : i32, i32
  }
  func.func @transform_5(%arg0: i32) -> (i32, i32) {
    %c0_i32 = arith.constant 0 : i32
    %c0_i32_0 = arith.constant 0 : i32
    return %arg0, %c0_i32 : i32, i32
  }
  func.func @transform_6(%arg0: i32) -> (i32, i32, i32) {
    %c0_i32 = arith.constant 0 : i32
    %c0_i32_0 = arith.constant 0 : i32
    %c0_i32_1 = arith.constant 0 : i32
    return %arg0, %c0_i32, %c0_i32_0 : i32, i32, i32
  }
}

</mosaic_0001>

<bundles_post_ra>
// kernel: tpu_custom_call.1
= control target key start
LH: loop header
LB: loop body
LE: loop exit
PB: predicated region body
PF: predicated region fallthrough
CT: control target
= control target key end

     0   :  { %s2046_s0 = inlined_call_operand.hbm [shape: f32[64,128], index: 0, kind: input, shape index: {}]   ;;  %s2047_s1 = inlined_call_operand.hbm [shape: f32[128,128], index: 1, kind: input, shape index: {}]   ;;  %s2048_s2 = inlined_call_operand.vmem [shape: f32[1,128], index: 2, kind: input, shape index: {}]   ;;  %s2049_s3 = inlined_call_operand.hbm [shape: f32[128,128], index: 3, kind: input, shape index: {}]   ;;  %s2050_s4 = inlined_call_operand.vmem [shape: f32[1,128], index: 4, kind: input, shape index: {}]   ;;  %s2051_s5 = inlined_call_operand.hbm [shape: f32[64,128], index: 5, kind: output, shape index: {0}]   ;;  %s2052_s6 = inlined_call_operand.hbm [shape: f32[2,8,128], index: 6, kind: output, shape index: {1}]  }
   0x1   :  { %2056 = sst [smem:[#allocation15_spill]] %s2046_s0 }
   0x2   :  { %2057 = sst [smem:[#allocation16_spill]] %s2047_s1 }
   0x3   :  { %12 = vsyncpa [#allocation3], 0 }
   0x4   :  { %14 = vsyncpa [#allocation3 + $0x1], 0 }
   0x5   :  { %15 = vsyncpa [#allocation6], 0 }
   0x6   :  { %16 = vsyncpa [#allocation4], 0 }
   0x7   :  { %18 = vsyncpa [#allocation4 + $0x1], 0 }
   0x8   :  { %19 = vsyncpa [#allocation10], 0 }
   0x9   :  { %21 = vsyncpa [#allocation10 + $0x1], 0  ;;  %s1587_s21 = smov 0   ;;  %s1589_s22 = smov 0  }
   0xa   :  { %s1591_s23 = smov 0   ;;  %s1593_s24 = smov 0  }
   0xb LB: > { %s1608_s25 = sadd.s32 4294967295, %s1540_s24   ;;  %s1059_s26 = sadd.s32 4294967294, %s1540_s24   ;;  %s1540_s24 = sphi %s1593_s24, %s2109_s24   ;;  %s1536_s23 = sphi %s1591_s23, %s2108_s23   ;;  %s1532_s22 = sphi %s1589_s22, %s2107_s22   ;;  %s1528_s21 = sphi %s1587_s21, %s2106_s21  }
   0xc   : > { %p47_p0 = scmp.ne.s32.totalorder %s1532_s22, %s1528_s21  ;;  %p2053_p1 = scmp.eq.s32.totalorder %s1608_s25, 0 }
   0xd   : > { %p161_p3 = scmp.eq.s32.totalorder %s1059_s26, 1  ;;  %p1060_p5 = scmp.ge.s32.totalorder %s1540_s24, 1 }
   0xe   : > { %p1617_p4 = por %p2053_p1, %p47_p0  ;;  %p194_p7 = scmp.lt.s32.totalorder %s1540_s24, 3 }
   0xf   : > { %p1622_p6 = por %p161_p3, %p47_p0  ;;  %s1542_s30 = smov [#allocation5]  }
  0x10   : > { %s2058_s27 = scalar_select %p1617_p4, 1, 0 }
  0x11   : > { %s2059_s28 = scalar_select %p1622_p6, 1, 0 }
  0x12   : > { %p1627_p8 = pnand %p1060_p5, %p194_p7  ;;  %s206_s7 = sshll.u32 %s1542_s30, 4  ;;  %s1631_s7 = int_to_ptr.vmem [resolvable:$true] %s206_s7 }
  0x13   : > { %s1543_s9 = smov [#allocation7]   ;;  %s2062_s1 = sld [smem:[#allocation16_spill]] }
  0x14   : > { %p1289_p9 = pneg %p1627_p8  ;;  %s222_s10 = sshll.u32 %s1543_s9, 4  ;;  %s1642_s10 = int_to_ptr.vmem [resolvable:$true] %s222_s10 }
  0x16   : > { %p1638_p11 = pnand %p1289_p9, %p2053_p1 }
  0x18   : > { %p1354_p13 = pneg %p1638_p11 }
  0x19   : > { %s1352_s13 = scalar_lea.hbm %s2062_s1, 2048 }
  0x1a   : > { %p1353_p12 = scmp.ne.s32.totalorder %s2062_s1, %s1352_s13  ;;  %p1359_p5 = scmp.lt.u32.totalorder %s1352_s13, %s2062_s1 }
  0x1c   : > { %p1355_p0 = pnand %p1354_p13, %p1353_p12 }
  0x1e   : > { %p1356_p3 = pneg %p1355_p0 }
  0x20   : > { %p1361_p7 = pnand %p1359_p5, %p1356_p3 }
  0x22   : > { %1364 = shalt.err (!%p1361_p7)
}
  0x23   : > { %s1365_s18 = scalar_lea.vmem %s1631_s7, 2048  ;;  %p1373_p2 = scmp.lt.s32.totalorder %s1631_s7, %s1631_s7 }
  0x24   : > { %p1366_p9 = scmp.ne.s32.totalorder %s1631_s7, %s1365_s18  ;;  %p1374_p12 = scmp.lt.s32.totalorder %s1365_s18, %s1365_s18 }
  0x26   : > { %p1368_p10 = pnand %p1366_p9, %p1354_p13  ;;  %p1375_p0 = por %p1374_p12, %p1373_p2 }
  0x28   : > { %p1369_p1 = pneg %p1368_p10 }
  0x2a   : > { %p1376_p6 = pnand %p1375_p0, %p1369_p1 }
  0x2c   : > { %1379 = shalt.err (!%p1376_p6)
}
  0x2d   : > { %s1544_s19 = smov 128   ;;  %s1545_s20 = smov 8  }
  0x2e   : > { %1292 = dma.hbm_to_vmem [thread:$0]  (!%p1638_p11), %s2062_s1, 2048, %s1631_s7, [#allocation6], %s1544_s19, %s1544_s19, %s1545_s20  }
  0x2f   : > { %s1380_s12 = scalar_lea.hbm %s2049_s3, 2048 }
  0x30   : > { %p1381_p1 = scmp.ne.s32.totalorder %s2049_s3, %s1380_s12  ;;  %p1387_p10 = scmp.lt.u32.totalorder %s1380_s12, %s2049_s3 }
  0x32   : > { %p1383_p2 = pnand %p1381_p1, %p1354_p13 }
  0x34   : > { %p1384_p6 = pneg %p1383_p2 }
  0x36   : > { %p1389_p3 = pnand %p1387_p10, %p1384_p6 }
  0x38   : > { %1392 = shalt.err (!%p1389_p3)
}
  0x39   : > { %s1393_s7 = scalar_lea.vmem %s1642_s10, 2048  ;;  %p1401_p12 = scmp.lt.s32.totalorder %s1642_s10, %s1642_s10 }
  0x3a   : > { %p1394_p5 = scmp.ne.s32.totalorder %s1642_s10, %s1393_s7  ;;  %p1402_p0 = scmp.lt.s32.totalorder %s1393_s7, %s1393_s7 }
  0x3c   : > { %p1396_p7 = pnand %p1394_p5, %p1354_p13  ;;  %p1403_p1 = por %p1402_p0, %p1401_p12 }
  0x3e   : > { %p1397_p9 = pneg %p1396_p7 }
  0x40   : > { %p1404_p2 = pnand %p1403_p1, %p1397_p9 }
  0x42   : > { %1407 = shalt.err (!%p1404_p2)
}
  0x43   : > { %1295 = dma.hbm_to_vmem [thread:$0]  (!%p1638_p11), %s2049_s3, 2048, %s1642_s10, [#allocation6], %s1544_s19, %s1544_s19, %s1545_s20  }
  0x44   : > { %s1703_s8 = sadd.s32 1, %s1540_s24   ;;  %s34_s26 = sadd.s32 1, %s1536_s23 }
  0x45   : > { %s31_s30 = ssub.s32 %s1540_s24, %s1703_s8  ;;  %p41_p13 = scmp.ne.s32.totalorder %s1536_s23, %s1532_s22 }
  0x46   : > { %p32_p6 = scmp.eq.s32.totalorder %s31_s30, 0  ;;  %p42_p10 = scmp.eq.s32.totalorder %s1540_s24, 0 }
  0x47   : > { %p2063_p3 = scmp.eq.s32.totalorder %s1608_s25, 1  ;;  %p1309_p7 = scmp.lt.s32.totalorder %s1540_s24, 2 }
  0x48   : > { %s1719_s11 = scalar_select %p32_p6, %s1536_s23, %s34_s26  }
  0x49   : > { %p1713_p5 = por %p2063_p3, %p41_p13  ;;  %p43_p9 = por %p42_p10, %p41_p13 }
  0x4a   : > { %s239_s12 = sand.u32 1, %s1536_s23   ;;  %s1089_s10 = sshll.u32 %s1540_s24, 9 }
  0x4b   : > { %s2064_s9 = scalar_select %p1713_p5, 1, 0 }
  0x4c   : > { %s1064_s13 = sshll.u32 %s239_s12, 5  ;;  %s2065_s0 = sld [smem:[#allocation15_spill]] }
  0x4d   : > { %s243_s7 = scalar_lea.vmem [#allocation2], %s1064_s13  ;;  %p1730_p11 = pnand %p1309_p7, %p43_p9 }
  0x4e   : > { %s250_s17 = sshll.u32 %s243_s7, 4  ;;  %s1734_s26 = scalar_lea.sflag [#allocation3], %s239_s12  ;;  %s1728_s17 = int_to_ptr.vmem [resolvable:$true] %s250_s17 }
  0x4f   : > { %p1410_p0 = pneg %p1730_p11 }
  0x52   : > { %s1726_s16 = scalar_lea.hbm %s2065_s0, %s1089_s10  ;;  %s1413_s14 = scalar_lea.hbm %s2065_s0, 1024 }
  0x53   : > { %s1408_s30 = scalar_lea.hbm %s1726_s16, 512  ;;  %p1414_p13 = scmp.lt.u32.totalorder %s1726_s16, %s2065_s0 }
  0x54   : > { %p1409_p12 = scmp.ne.s32.totalorder %s1726_s16, %s1408_s30  ;;  %p1415_p6 = scmp.lt.u32.totalorder %s1413_s14, %s1408_s30 }
  0x55   : > { %p1417_p3 = scmp.lt.u32.totalorder %s1408_s30, %s1726_s16 }
  0x56   : > { %p1411_p1 = pnand %p1410_p0, %p1409_p12  ;;  %p1416_p10 = por %p1415_p6, %p1414_p13 }
  0x58   : > { %p1412_p2 = pneg %p1411_p1  ;;  %p1418_p7 = por %p1417_p3, %p1416_p10 }
  0x5a   : > { %p1419_p9 = pnand %p1418_p7, %p1412_p2 }
  0x5c   : > { %1422 = shalt.err (!%p1419_p9)
}
  0x5d   : > { %s1423_s12 = scalar_lea.vmem %s1728_s17, 512  ;;  %s1546_s13 = smov [#allocation2]  }
  0x5e   : > { %p1424_p12 = scmp.ne.s32.totalorder %s1728_s17, %s1423_s12  ;;  %s1428_s10 = sshll.u32 %s1546_s13, 4  ;;  %s1429_s10 = int_to_ptr.vmem [resolvable:$false] %s1428_s10 }
  0x5f   : > { %s1430_s15 = scalar_lea.vmem %s1429_s10, 1024  ;;  %p1431_p4 = scmp.lt.s32.totalorder %s1728_s17, %s1429_s10 }
  0x60   : > { %p1426_p1 = pnand %p1424_p12, %p1410_p0  ;;  %p1432_p13 = scmp.lt.s32.totalorder %s1430_s15, %s1423_s12 }
  0x62   : > { %p1427_p5 = pneg %p1426_p1  ;;  %p1433_p6 = por %p1432_p13, %p1431_p4 }
  0x64   : > { %p1434_p10 = pnand %p1433_p6, %p1427_p5 }
  0x66   : > { %1437 = shalt.err (!%p1434_p10)
}
  0x67   : > { %1299 = dma.hbm_to_vmem [thread:$0]  (!%p1730_p11), %s1726_s16, 512, %s1728_s17, %s1734_s26, %s1544_s19, %s1544_s19, %s1545_s20  }
  0x68   : > { %262 = sbr.rel (%p1627_p8) target bundleno = 2235 (0x8bb), region = 40  ;;  %s1768_s30 = sand.u32 (!%p1627_p8), 1, %s1532_s22  }
  0x69   : > { %s1068_s14 = sshll.u32 (!%p1627_p8), %s1768_s30, 5  ;;  %s265_s7 = scalar_lea.sflag (!%p1627_p8), [#allocation3], %s1768_s30 }
  0x6a   : > { %s1774_s18 = scalar_lea.vmem (!%p1627_p8), [#allocation2], %s1068_s14  ;;  %p2067_p4 = scmp.ne.s32.totalorder (!%p1627_p8), %s2058_s27, 0 }
  0x6f   : > { %1511 = dma.done.wait (%p2067_p4), %s265_s7, 512  }
  0x70   : > { %1513 = vsyncadd (%p2067_p4), %s265_s7, 4294966784  ;;  %p2068_p5 = scmp.eq.s32.totalorder %s1608_s25, 0 }
  0x72   : > { %1515 = dma.done.wait (%p2068_p5), [#allocation6], 4096   ;;  %p2069_p8 = pmov %p2068_p5 }
  0x73   : > { %s1072_s29 = sshll.u32 %s1768_s30, 3  ;;  %v316_v0 = vld [vmem:[#allocation5] sm:$0xff]  ;;  %v317_v1 = vld [vmem:[#allocation5 + $0x8] sm:$0xff]  ;;  %v318_v2 = vld [vmem:[#allocation5 + $0x10] sm:$0xff]  ;;  %s1943_s17 = scalar_lea.vmem [#allocation8], %s1068_s14 }
  0x74   : > { %1517 = vsyncadd (%p2069_p8), [#allocation6], 4294963200  ;;  %v1207_v3 = vpack.c.bf16 %v317_v1, %v316_v0  ;;  %v319_v4 = vld [vmem:[#allocation5 + $0x18] sm:$0xff]  ;;  %v320_v6 = vld [vmem:[#allocation5 + $0x20] sm:$0xff]  ;;  %s1952_s26 = scalar_lea.vmem [#allocation9], %s1072_s29  ;;  %p2102_p11 = scmp.eq.s32.totalorder %s1608_s25, 1 }
  0x75   : > { %v1211_v5 = vpack.c.bf16 %v319_v4, %v318_v2  ;;  %v321_v7 = vld [vmem:[#allocation5 + $0x28] sm:$0xff]  ;;  %v1786_v9 = vld [vmem:[%s1774_s18] sm:$0xff]  ;;  %v322_v10 = vld [vmem:[#allocation5 + $0x30] sm:$0xff] }
  0x76   : > { %1208 = vmatprep.subr.bf16.mxu0 %v1207_v3  ;;  %v1215_v8 = vpack.c.bf16 %v321_v7, %v320_v6  ;;  %v323_v11 = vld [vmem:[#allocation5 + $0x38] sm:$0xff]  ;;  %1163 = vmatprep.mubr.f32.mxu0 %v1786_v9  ;;  %v324_v13 = vld [vmem:[#allocation5 + $0x40] sm:$0xff]  ;;  %v325_v14 = vld [vmem:[#allocation5 + $0x48] sm:$0xff] }
  0x77   : > { %1210 = vmatpush3.bf16.msra.mxu0 %v1207_v3  ;;  %v1219_v12 = vpack.c.bf16 %v323_v11, %v322_v10  ;;  %v1223_v15 = vpack.c.bf16 %v325_v14, %v324_v13  ;;  %v326_v16 = vld [vmem:[#allocation5 + $0x50] sm:$0xff]  ;;  %v327_v17 = vld [vmem:[#allocation5 + $0x58] sm:$0xff]  ;;  %v328_v19 = vld [vmem:[#allocation5 + $0x60] sm:$0xff] }
  0x78   : > { %1212 = vmatprep.subr.bf16.mxu0 %v1211_v5  ;;  %v1227_v18 = vpack.c.bf16 %v327_v17, %v326_v16  ;;  %v329_v20 = vld [vmem:[#allocation5 + $0x68] sm:$0xff]  ;;  %v330_v22 = vld [vmem:[#allocation5 + $0x70] sm:$0xff]  ;;  %v331_v23 = vld [vmem:[#allocation5 + $0x78] sm:$0xff] }
  0x79   : > { %v1231_v21 = vpack.c.bf16 %v329_v20, %v328_v19  ;;  %v1235_v24 = vpack.c.bf16 %v331_v23, %v330_v22  ;;  %v1790_v25 = vld [vmem:[%s1774_s18 + $0x8] sm:$0xff]  ;;  %v1793_v26 = vld [vmem:[%s1774_s18 + $0x10] sm:$0xff]  ;;  %v1798_v27 = vld [vmem:[%s1774_s18 + $0x18] sm:$0xff] }
  0x7a   : > { %v1073_v28 = vld [vmem:[%s2048_s2] ss:$0 sm:$0xff] }
  0x7b   : > { %1214 = vmatpush3.bf16.msra.mxu0 %v1211_v5  ;;  %v716_v7 = vld [vmem:[#allocation7 + $0x20] sm:$0xff] }
  0x7c   : > { %1216 = vmatprep.subr.bf16.mxu0 %v1215_v8  ;;  %v724_v20 = vld [vmem:[#allocation7 + $0x60] sm:$0xff] }
  0x7f   : > { %1218 = vmatpush3.bf16.msra.mxu0 %v1215_v8 }
  0x80   : > { %1220 = vmatprep.subr.bf16.mxu0 %v1219_v12 }
  0x83   : > { %1222 = vmatpush3.bf16.msra.mxu0 %v1219_v12 }
  0x84   : > { %1224 = vmatprep.subr.bf16.mxu0 %v1223_v15 }
  0x87   : > { %1226 = vmatpush3.bf16.msra.mxu0 %v1223_v15 }
  0x88   : > { %1228 = vmatprep.subr.bf16.mxu0 %v1227_v18 }
  0x8b   : > { %1230 = vmatpush3.bf16.msra.mxu0 %v1227_v18 }
  0x8c   : > { %1232 = vmatprep.subr.bf16.mxu0 %v1231_v21 }
  0x8f   : > { %1234 = vmatpush3.bf16.msra.mxu0 %v1231_v21 }
  0x90   : > { %1236 = vmatprep.subr.bf16.mxu0 %v1235_v24 }
  0x93   : > { %1238 = vmatpush3.bf16.msra.mxu0 %v1235_v24 }
  0x96   : > { %1164 = vmatmul.mubr.f32.vlgmr.msra.gmra.mrb[0].mxu0 %v1790_v25 }
  0x97   : > { %1166 = vmatprep.mubr.f32.mxu0 %v1793_v26 }
  0x9a   : > { %1167 = vmatmul.mubr.f32.gmra.mrb[2].mxu0 %v1798_v27 }
 0x169   : > { %v1165_v29 = vpop.f32.mrb[0].mxu0 }
 0x16a   : > { %v405_v30 = vpop.f32.mrb[1].mxu0  ;;  %v411_v32 = vadd.f32 %v1165_v29, %v1073_v28 }
 0x16b   : > { %v406_v31 = vadd.f32 %v1073_v28, %v405_v30 }
 0x16c   : > { %v425_v37 = vmax.f32 %v411_v32, 0.0 }
 0x16d   : > { %v424_v33 = vmax.f32 %v406_v31, 0.0  ;;  %v1168_v34 = vpop.f32.mrb[2].mxu0 }
 0x16e   : > { %v415_v35 = vpop.f32.mrb[3].mxu0  ;;  %v421_v38 = vadd.f32 %v1168_v34, %v1073_v28 }
 0x16f   : > { %v416_v36 = vadd.f32 %v1073_v28, %v415_v35  ;;  %428 = vmax.xlane.f32.xlu0 %v424_v33 }
 0x170   : > { %v427_v40 = vmax.f32 %v421_v38, 0.0 }
 0x171   : > { %v426_v39 = vmax.f32 %v416_v36, 0.0 }
 0x173   : > { %432 = vmax.xlane.f32.xlu1 %v426_v39  ;;  %430 = vmax.xlane.f32.xlu0 %v425_v37 }
 0x177   : > { %434 = vmax.xlane.f32.xlu1 %v427_v40 }
 0x1fc   : > { %v429_v41 = vpop.xlane.xlu0 %428 }
 0x1fd   : > { %vm440_vm0 = vcmp.gt.f32.partialorder %v429_v41, 0.0  ;;  %vm436_vm1 = vcmp.eq.f32.partialorder %v424_v33, %v429_v41 }
 0x1fe   : > { %v460_v42 = vsel %vm436_vm1, -inf, %v424_v33  ;;  %vm1804_vm2 = vmand %vm436_vm1, %vm440_vm0 }
 0x1ff   : > { %464 = vmax.xlane.f32.xlu0 %v460_v42  ;;  %v456_v44 = vsel %vm1804_vm2, %v429_v41, 0.0 }
 0x200   : > { %v433_v45 = vpop.xlane.xlu1 %432  ;;  %v431_v46 = vpop.xlane.xlu0 %430 }
 0x201   : > { %vm442_vm3 = vcmp.gt.f32.partialorder %v433_v45, 0.0  ;;  %vm438_vm4 = vcmp.eq.f32.partialorder %v426_v39, %v433_v45  ;;  %vm437_vm5 = vcmp.eq.f32.partialorder %v425_v37, %v431_v46  ;;  %vm441_vm8 = vcmp.gt.f32.partialorder %v431_v46, 0.0 }
 0x202   : > { %vm1810_vm6 = vmand %vm438_vm4, %vm442_vm3  ;;  %v462_v48 = vsel %vm438_vm4, -inf, %v426_v39  ;;  %v461_v49 = vsel %vm437_vm5, -inf, %v425_v37 }
 0x203   : > { %v458_v50 = vsel %vm1810_vm6, %v433_v45, 0.0  ;;  %468 = vmax.xlane.f32.xlu0 %v462_v48  ;;  %466 = vmax.xlane.f32.xlu1 %v461_v49  ;;  %vm1819_vm13 = vmand %vm437_vm5, %vm441_vm8 }
 0x204   : > { %v435_v51 = vpop.xlane.xlu1 %434  ;;  %v457_v60 = vsel %vm1819_vm13, %v431_v46, 0.0 }
 0x205   : > { %vm439_vm7 = vcmp.eq.f32.partialorder %v427_v40, %v435_v51  ;;  %vm443_vm11 = vcmp.gt.f32.partialorder %v435_v51, 0.0 }
 0x206   : > { %v463_v52 = vsel %vm439_vm7, -inf, %v427_v40  ;;  %vm1824_vm14 = vmand %vm439_vm7, %vm443_vm11 }
 0x207   : > { %470 = vmax.xlane.f32.xlu1 %v463_v52  ;;  %v459_v2 = vsel %vm1824_vm14, %v435_v51, 0.0 }
 0x28c   : > { %v465_v53 = vpop.xlane.xlu0 %464 }
 0x28d   : > { %vm476_vm9 = vcmp.gt.f32.partialorder %v465_v53, 0.0  ;;  %vm472_vm10 = vcmp.eq.f32.partialorder %v460_v42, %v465_v53 }
 0x28e   : > { %v496_v54 = vsel %vm472_vm10, -inf, %v460_v42  ;;  %vm488_vm12 = vmand %vm472_vm10, %vm476_vm9 }
 0x28f   : > { %500 = vmax.xlane.f32.xlu0 %v496_v54  ;;  %v492_v56 = vsel %vm488_vm12, %v465_v53, %v456_v44 }
 0x290   : > { %v467_v57 = vpop.xlane.xlu1 %466  ;;  %v469_v58 = vpop.xlane.xlu0 %468 }
 0x291   : > { %vm477_vm15 = vcmp.gt.f32.partialorder %v467_v57, 0.0  ;;  %vm478_vm0 = vcmp.gt.f32.partialorder %v469_v58, 0.0  ;;  %vm473_vm1 = vcmp.eq.f32.partialorder %v461_v49, %v467_v57  ;;  %vm474_vm2 = vcmp.eq.f32.partialorder %v462_v48, %v469_v58 }
 0x292   : > { %v497_v61 = vsel %vm473_vm1, -inf, %v461_v49  ;;  %vm489_vm3 = vmand %vm473_vm1, %vm477_vm15  ;;  %v498_v62 = vsel %vm474_vm2, -inf, %v462_v48 }
 0x293   : > { %502 = vmax.xlane.f32.xlu1 %v497_v61  ;;  %v493_v63 = vsel %vm489_vm3, %v467_v57, %v457_v60  ;;  %504 = vmax.xlane.f32.xlu0 %v498_v62  ;;  %vm490_vm4 = vmand %vm474_vm2, %vm478_vm0 }
 0x294   : > { %v494_v0 = vsel %vm490_vm4, %v469_v58, %v458_v50  ;;  %v471_v1 = vpop.xlane.xlu1 %470 }
 0x295   : > { %vm479_vm5 = vcmp.gt.f32.partialorder %v471_v1, 0.0  ;;  %vm475_vm6 = vcmp.eq.f32.partialorder %v463_v52, %v471_v1 }
 0x296   : > { %v499_v3 = vsel %vm475_vm6, -inf, %v463_v52  ;;  %vm491_vm7 = vmand %vm475_vm6, %vm479_vm5 }
 0x297   : > { %506 = vmax.xlane.f32.xlu1 %v499_v3  ;;  %v495_v4 = vsel %vm491_vm7, %v471_v1, %v459_v2  ;;  %v712_v1 = vld [vmem:[#allocation7] sm:$0xff]  ;;  %v713_v2 = vld [vmem:[#allocation7 + $0x8] sm:$0xff] }
 0x31c   : > { %v501_v5 = vpop.xlane.xlu0 %500 }
 0x31d   : > { %vm512_vm8 = vcmp.gt.f32.partialorder %v501_v5, 0.0  ;;  %vm508_vm9 = vcmp.eq.f32.partialorder %v496_v54, %v501_v5 }
 0x31e   : > { %v532_v6 = vsel %vm508_vm9, -inf, %v496_v54  ;;  %vm1832_vm10 = vmand %vm508_vm9, %vm512_vm8 }
 0x31f   : > { %536 = vmax.xlane.f32.xlu0 %v532_v6  ;;  %v528_v8 = vsel %vm1832_vm10, %v501_v5, %v492_v56  ;;  %v715_v5 = vld [vmem:[#allocation7 + $0x18] sm:$0xff] }
 0x320   : > { %v503_v10 = vpop.xlane.xlu1 %502  ;;  %v505_v11 = vpop.xlane.xlu0 %504 }
 0x321   : > { %vm513_vm11 = vcmp.gt.f32.partialorder %v503_v10, 0.0  ;;  %vm514_vm12 = vcmp.gt.f32.partialorder %v505_v11, 0.0  ;;  %vm509_vm13 = vcmp.eq.f32.partialorder %v497_v61, %v503_v10  ;;  %vm510_vm14 = vcmp.eq.f32.partialorder %v498_v62, %v505_v11 }
 0x322   : > { %v533_v12 = vsel %vm509_vm13, -inf, %v497_v61  ;;  %vm1838_vm15 = vmand %vm509_vm13, %vm513_vm11  ;;  %v534_v14 = vsel %vm510_vm14, -inf, %v498_v62 }
 0x323   : > { %538 = vmax.xlane.f32.xlu1 %v533_v12  ;;  %v529_v15 = vsel %vm1838_vm15, %v503_v10, %v493_v63  ;;  %540 = vmax.xlane.f32.xlu0 %v534_v14  ;;  %vm1844_vm0 = vmand %vm510_vm14, %vm514_vm12 }
 0x324   : > { %v530_v17 = vsel %vm1844_vm0, %v505_v11, %v494_v0  ;;  %v507_v18 = vpop.xlane.xlu1 %506  ;;  %v718_v11 = vld [vmem:[#allocation7 + $0x30] sm:$0xff] }
 0x325   : > { %vm515_vm1 = vcmp.gt.f32.partialorder %v507_v18, 0.0  ;;  %vm511_vm2 = vcmp.eq.f32.partialorder %v499_v3, %v507_v18 }
 0x326   : > { %v535_v19 = vsel %vm511_vm2, -inf, %v499_v3  ;;  %vm1850_vm3 = vmand %vm511_vm2, %vm515_vm1  ;;  %v714_v3 = vld [vmem:[#allocation7 + $0x10] sm:$0xff] }
 0x327   : > { %542 = vmax.xlane.f32.xlu1 %v535_v19  ;;  %v531_v21 = vsel %vm1850_vm3, %v507_v18, %v495_v4  ;;  %v1239_v4 = vpack.c.bf16 %v713_v2, %v712_v1  ;;  %v723_v18 = vld [vmem:[#allocation7 + $0x58] sm:$0xff] }
 0x329   : > { %1240 = vmatprep.subr.bf16.mxu1 %v1239_v4 }
 0x32a   : > { %1242 = vmatpush3.bf16.msra.mxu1 %v1239_v4 }
 0x3ac   : > { %v537_v22 = vpop.xlane.xlu0 %536 }
 0x3ad   : > { %vm548_vm4 = vcmp.gt.f32.partialorder %v537_v22, 0.0  ;;  %vm544_vm5 = vcmp.eq.f32.partialorder %v532_v6, %v537_v22 }
 0x3ae   : > { %v568_v23 = vsel %vm544_vm5, -inf, %v532_v6  ;;  %vm560_vm6 = vmand %vm544_vm5, %vm548_vm4  ;;  %v1243_v6 = vpack.c.bf16 %v715_v5, %v714_v3 }
 0x3af   : > { %572 = vmax.xlane.f32.xlu0 %v568_v23  ;;  %v564_v24 = vsel %vm560_vm6, %v537_v22, %v528_v8  ;;  %v717_v8 = vld [vmem:[#allocation7 + $0x28] sm:$0xff] }
 0x3b0   : > { %v539_v28 = vpop.xlane.xlu1 %538  ;;  %v541_v29 = vpop.xlane.xlu0 %540  ;;  %1244 = vmatprep.subr.bf16.mxu1 %v1243_v6  ;;  %v1247_v10 = vpack.c.bf16 %v717_v8, %v716_v7 }
 0x3b1   : > { %vm549_vm7 = vcmp.gt.f32.partialorder %v539_v28, 0.0  ;;  %vm550_vm8 = vcmp.gt.f32.partialorder %v541_v29, 0.0  ;;  %vm545_vm9 = vcmp.eq.f32.partialorder %v533_v12, %v539_v28  ;;  %vm546_vm10 = vcmp.eq.f32.partialorder %v534_v14, %v541_v29  ;;  %1246 = vmatpush3.bf16.msra.mxu1 %v1243_v6 }
 0x3b2   : > { %v569_v30 = vsel %vm545_vm9, -inf, %v533_v12  ;;  %vm561_vm11 = vmand %vm545_vm9, %vm549_vm7  ;;  %v570_v31 = vsel %vm546_vm10, -inf, %v534_v14  ;;  %v719_v12 = vld [vmem:[#allocation7 + $0x38] sm:$0xff]  ;;  %1248 = vmatprep.subr.bf16.mxu1 %v1247_v10  ;;  %v720_v14 = vld [vmem:[#allocation7 + $0x40] sm:$0xff] }
 0x3b3   : > { %574 = vmax.xlane.f32.xlu1 %v569_v30  ;;  %v565_v32 = vsel %vm561_vm11, %v539_v28, %v529_v15  ;;  %576 = vmax.xlane.f32.xlu0 %v570_v31  ;;  %vm562_vm12 = vmand %vm546_vm10, %vm550_vm8  ;;  %v1251_v13 = vpack.c.bf16 %v719_v12, %v718_v11  ;;  %v721_v15 = vld [vmem:[#allocation7 + $0x48] sm:$0xff] }
 0x3b4   : > { %v566_v33 = vsel %vm562_vm12, %v541_v29, %v530_v17  ;;  %v543_v34 = vpop.xlane.xlu1 %542  ;;  %v1255_v16 = vpack.c.bf16 %v721_v15, %v720_v14  ;;  %v722_v17 = vld [vmem:[#allocation7 + $0x50] sm:$0xff] }
 0x3b5   : > { %vm551_vm13 = vcmp.gt.f32.partialorder %v543_v34, 0.0  ;;  %vm547_vm14 = vcmp.eq.f32.partialorder %v535_v19, %v543_v34  ;;  %1250 = vmatpush3.bf16.msra.mxu1 %v1247_v10 }
 0x3b6   : > { %v571_v35 = vsel %vm547_vm14, -inf, %v535_v19  ;;  %vm563_vm15 = vmand %vm547_vm14, %vm551_vm13  ;;  %1252 = vmatprep.subr.bf16.mxu1 %v1251_v13  ;;  %v1259_v19 = vpack.c.bf16 %v723_v18, %v722_v17 }
 0x3b7   : > { %578 = vmax.xlane.f32.xlu1 %v571_v35  ;;  %v567_v36 = vsel %vm563_vm15, %v543_v34, %v531_v21  ;;  %v725_v21 = vld [vmem:[#allocation7 + $0x68] sm:$0xff] }
 0x3b8   : > { %v1263_v22 = vpack.c.bf16 %v725_v21, %v724_v20 }
 0x3b9   : > { %1254 = vmatpush3.bf16.msra.mxu1 %v1251_v13 }
 0x3ba   : > { %1256 = vmatprep.subr.bf16.mxu1 %v1255_v16 }
 0x3bd   : > { %1258 = vmatpush3.bf16.msra.mxu1 %v1255_v16 }
 0x3be   : > { %1260 = vmatprep.subr.bf16.mxu1 %v1259_v19 }
 0x3c1   : > { %1262 = vmatpush3.bf16.msra.mxu1 %v1259_v19 }
 0x3c2   : > { %1264 = vmatprep.subr.bf16.mxu1 %v1263_v22 }
 0x3c5   : > { %1266 = vmatpush3.bf16.msra.mxu1 %v1263_v22 }
 0x43c   : > { %v573_v37 = vpop.xlane.xlu0 %572 }
 0x43d   : > { %vm584_vm0 = vcmp.gt.f32.partialorder %v573_v37, 0.0  ;;  %vm580_vm1 = vcmp.eq.f32.partialorder %v568_v23, %v573_v37 }
 0x43e   : > { %v604_v38 = vsel %vm580_vm1, -inf, %v568_v23  ;;  %vm1856_vm2 = vmand %vm580_vm1, %vm584_vm0 }
 0x43f   : > { %608 = vmax.xlane.f32.xlu0 %v604_v38  ;;  %v600_v40 = vsel %vm1856_vm2, %v573_v37, %v564_v24 }
 0x440   : > { %v575_v41 = vpop.xlane.xlu1 %574  ;;  %v577_v42 = vpop.xlane.xlu0 %576 }
 0x441   : > { %vm585_vm3 = vcmp.gt.f32.partialorder %v575_v41, 0.0  ;;  %vm586_vm4 = vcmp.gt.f32.partialorder %v577_v42, 0.0  ;;  %vm581_vm5 = vcmp.eq.f32.partialorder %v569_v30, %v575_v41  ;;  %vm582_vm6 = vcmp.eq.f32.partialorder %v570_v31, %v577_v42 }
 0x442   : > { %v605_v43 = vsel %vm581_vm5, -inf, %v569_v30  ;;  %vm1862_vm7 = vmand %vm581_vm5, %vm585_vm3  ;;  %v606_v45 = vsel %vm582_vm6, -inf, %v570_v31 }
 0x443   : > { %610 = vmax.xlane.f32.xlu1 %v605_v43  ;;  %v601_v46 = vsel %vm1862_vm7, %v575_v41, %v565_v32  ;;  %612 = vmax.xlane.f32.xlu0 %v606_v45  ;;  %vm1868_vm8 = vmand %vm582_vm6, %vm586_vm4 }
 0x444   : > { %v602_v48 = vsel %vm1868_vm8, %v577_v42, %v566_v33  ;;  %v579_v49 = vpop.xlane.xlu1 %578  ;;  %v726_v42 = vld [vmem:[#allocation7 + $0x70] sm:$0xff] }
 0x445   : > { %vm587_vm9 = vcmp.gt.f32.partialorder %v579_v49, 0.0  ;;  %vm583_vm10 = vcmp.eq.f32.partialorder %v571_v35, %v579_v49 }
 0x446   : > { %v607_v50 = vsel %vm583_vm10, -inf, %v571_v35  ;;  %vm1874_vm11 = vmand %vm583_vm10, %vm587_vm9 }
 0x447   : > { %614 = vmax.xlane.f32.xlu1 %v607_v50  ;;  %v603_v52 = vsel %vm1874_vm11, %v579_v49, %v567_v36 }
 0x4cc   : > { %v609_v53 = vpop.xlane.xlu0 %608 }
 0x4cd   : > { %vm620_vm12 = vcmp.gt.f32.partialorder %v609_v53, 0.0  ;;  %vm616_vm13 = vcmp.eq.f32.partialorder %v604_v38, %v609_v53 }
 0x4ce   : > { %v1880_v54 = vsel %vm616_vm13, -inf, %v604_v38  ;;  %vm632_vm14 = vmand %vm616_vm13, %vm620_vm12 }
 0x4cf   : > { %644 = vmax.xlane.f32.xlu0 %v1880_v54  ;;  %v1883_v55 = vsel %vm632_vm14, %v609_v53, %v600_v40  ;;  %v1074_v53 = vld [vmem:[%s2050_s4] ss:$0 sm:$0xff] }
 0x4d0   : > { %v611_v56 = vpop.xlane.xlu1 %610  ;;  %v613_v57 = vpop.xlane.xlu0 %612 }
 0x4d1   : > { %vm621_vm15 = vcmp.gt.f32.partialorder %v611_v56, 0.0  ;;  %vm622_vm0 = vcmp.gt.f32.partialorder %v613_v57, 0.0  ;;  %vm617_vm1 = vcmp.eq.f32.partialorder %v605_v43, %v611_v56  ;;  %vm618_vm2 = vcmp.eq.f32.partialorder %v606_v45, %v613_v57 }
 0x4d2   : > { %v1885_v58 = vsel %vm617_vm1, -inf, %v605_v43  ;;  %vm633_vm3 = vmand %vm617_vm1, %vm621_vm15  ;;  %v1887_v59 = vsel %vm618_vm2, -inf, %v606_v45  ;;  %v727_v43 = vld [vmem:[#allocation7 + $0x78] sm:$0xff] }
 0x4d3   : > { %646 = vmax.xlane.f32.xlu1 %v1885_v58  ;;  %v1890_v60 = vsel %vm633_vm3, %v611_v56, %v601_v46  ;;  %648 = vmax.xlane.f32.xlu0 %v1887_v59  ;;  %vm634_vm4 = vmand %vm618_vm2, %vm622_vm0  ;;  %v1267_v44 = vpack.c.bf16 %v727_v43, %v726_v42 }
 0x4d4   : > { %v1893_v61 = vsel %vm634_vm4, %v613_v57, %v602_v48  ;;  %v615_v62 = vpop.xlane.xlu1 %614 }
 0x4d5   : > { %vm623_vm5 = vcmp.gt.f32.partialorder %v615_v62, 0.0  ;;  %vm619_vm6 = vcmp.eq.f32.partialorder %v607_v50, %v615_v62  ;;  %1268 = vmatprep.subr.bf16.mxu1 %v1267_v44 }
 0x4d6   : > { %v1895_v63 = vsel %vm619_vm6, -inf, %v607_v50  ;;  %vm635_vm7 = vmand %vm619_vm6, %vm623_vm5  ;;  %1270 = vmatpush3.bf16.msra.mxu1 %v1267_v44 }
 0x4d7   : > { %650 = vmax.xlane.f32.xlu1 %v1895_v63  ;;  %v1898_v0 = vsel %vm635_vm7, %v615_v62, %v603_v52 }
 0x55c   : > { %v645_v23 = vpop.xlane.xlu0 %644 }
 0x55d   : > { %vm652_vm8 = vcmp.eq.f32.partialorder %v1880_v54, %v645_v23  ;;  %vm656_vm9 = vcmp.gt.f32.partialorder %v645_v23, 0.0 }
 0x55e   : > { %v676_v24 = vsel %vm652_vm8, -inf, %v1880_v54  ;;  %vm1902_vm10 = vmand %vm652_vm8, %vm656_vm9 }
 0x55f   : > { %680 = vmax.xlane.f32.xlu0 %v676_v24  ;;  %v672_v29 = vsel %vm1902_vm10, %v645_v23, %v1883_v55 }
 0x560   : > { %v647_v30 = vpop.xlane.xlu1 %646  ;;  %v649_v31 = vpop.xlane.xlu0 %648 }
 0x561   : > { %vm653_vm11 = vcmp.eq.f32.partialorder %v1885_v58, %v647_v30  ;;  %vm657_vm12 = vcmp.gt.f32.partialorder %v647_v30, 0.0  ;;  %vm654_vm13 = vcmp.eq.f32.partialorder %v1887_v59, %v649_v31  ;;  %vm658_vm14 = vcmp.gt.f32.partialorder %v649_v31, 0.0 }
 0x562   : > { %v677_v32 = vsel %vm653_vm11, -inf, %v1885_v58  ;;  %vm1912_vm15 = vmand %vm653_vm11, %vm657_vm12  ;;  %v678_v34 = vsel %vm654_vm13, -inf, %v1887_v59 }
 0x563   : > { %682 = vmax.xlane.f32.xlu1 %v677_v32  ;;  %684 = vmax.xlane.f32.xlu0 %v678_v34  ;;  %vm1917_vm0 = vmand %vm654_vm13, %vm658_vm14  ;;  %v673_v36 = vsel %vm1912_vm15, %v647_v30, %v1890_v60 }
 0x564   : > { %v651_v37 = vpop.xlane.xlu1 %650  ;;  %v674_v38 = vsel %vm1917_vm0, %v649_v31, %v1893_v61 }
 0x565   : > { %vm655_vm1 = vcmp.eq.f32.partialorder %v1895_v63, %v651_v37  ;;  %vm659_vm2 = vcmp.gt.f32.partialorder %v651_v37, 0.0 }
 0x566   : > { %v679_v39 = vsel %vm655_vm1, -inf, %v1895_v63  ;;  %vm1929_vm3 = vmand %vm655_vm1, %vm659_vm2 }
 0x567   : > { %686 = vmax.xlane.f32.xlu1 %v679_v39  ;;  %v675_v41 = vsel %vm1929_vm3, %v651_v37, %v1898_v0 }
 0x5ec   : > { %v681_v45 = vpop.xlane.xlu0 %680 }
 0x5ed   : > { %vm688_vm4 = vcmp.eq.f32.partialorder %v676_v24, %v681_v45  ;;  %vm692_vm5 = vcmp.gt.f32.partialorder %v681_v45, 0.0 }
 0x5ee   : > { %vm704_vm6 = vmand %vm688_vm4, %vm692_vm5 }
 0x5ef   : > { %v708_v46 = vsel %vm704_vm6, %v681_v45, %v672_v29 }
 0x5f0   : > { %v683_v47 = vpop.xlane.xlu1 %682  ;;  %1201 = vmatprep.mubr.f32.mxu1 %v708_v46  ;;  %v685_v48 = vpop.xlane.xlu0 %684 }
 0x5f1   : > { %vm689_vm7 = vcmp.eq.f32.partialorder %v677_v32, %v683_v47  ;;  %vm693_vm8 = vcmp.gt.f32.partialorder %v683_v47, 0.0  ;;  %vm690_vm9 = vcmp.eq.f32.partialorder %v678_v34, %v685_v48  ;;  %vm694_vm10 = vcmp.gt.f32.partialorder %v685_v48, 0.0 }
 0x5f2   : > { %vm706_vm11 = vmand %vm690_vm9, %vm694_vm10 }
 0x5f3   : > { %vm705_vm12 = vmand %vm689_vm7, %vm693_vm8  ;;  %v710_v49 = vsel %vm706_vm11, %v685_v48, %v674_v38 }
 0x5f4   : > { %v687_v50 = vpop.xlane.xlu1 %686  ;;  %v709_v51 = vsel %vm705_vm12, %v683_v47, %v673_v36 }
 0x5f5   : > { %vm691_vm13 = vcmp.eq.f32.partialorder %v679_v39, %v687_v50  ;;  %vm695_vm14 = vcmp.gt.f32.partialorder %v687_v50, 0.0  ;;  %1202 = vmatmul.mubr.f32.vlgmr.msra.gmra.mrb[0].mxu1 %v709_v51 }
 0x5f6   : > { %vm707_vm15 = vmand %vm691_vm13, %vm695_vm14  ;;  %1204 = vmatprep.mubr.f32.mxu1 %v710_v49 }
 0x5f7   : > { %v711_v52 = vsel %vm707_vm15, %v687_v50, %v675_v41 }
 0x5f9   : > { %1205 = vmatmul.mubr.f32.gmra.mrb[2].mxu1 %v711_v52 }
 0x6c8   : > { %v1203_v54 = vpop.f32.mrb[0].mxu1 }
 0x6c9   : > { %v1939_v55 = vadd.f32 %v1203_v54, %v1074_v53  ;;  %v801_v56 = vpop.f32.mrb[1].mxu1 }
 0x6ca   : > { %v802_v57 = vadd.f32 %v1074_v53, %v801_v56  ;;  %827 = sbr.rel (%p2102_p11) target bundleno = 1958 (0x7a6), region = 56 }
 0x6cb   : > { %821 = vst [vmem:[%s1943_s17 + $0x8] sm:$0xff] %v1939_v55  ;;  %v829_v63 = vsub.f32 (!%p2102_p11), %v1939_v55, %v1790_v25 }
 0x6cc   : > { %820 = vst [vmem:[%s1943_s17] sm:$0xff] %v802_v57  ;;  %v1206_v58 = vpop.f32.mrb[2].mxu1  ;;  %v828_v62 = vsub.f32 (!%p2102_p11), %v802_v57, %v1786_v9 }
 0x6cd   : > { %v817_v59 = vadd.f32 %v1206_v58, %v1074_v53  ;;  %v811_v60 = vpop.f32.mrb[3].mxu1  ;;  %v833_v3 = vmul.f32 (!%p2102_p11), %v829_v63, %v829_v63 }
 0x6ce   : > { %v812_v61 = vadd.f32 %v1074_v53, %v811_v60  ;;  %v832_v2 = vmul.f32 (!%p2102_p11), %v828_v62, %v828_v62 }
 0x6cf   : > { %823 = vst [vmem:[%s1943_s17 + $0x18] sm:$0xff] %v817_v59  ;;  %v831_v1 = vsub.f32 (!%p2102_p11), %v817_v59, %v1798_v27 }
 0x6d0   : > { %822 = vst [vmem:[%s1943_s17 + $0x10] sm:$0xff] %v812_v61  ;;  %v830_v0 = vsub.f32 (!%p2102_p11), %v812_v61, %v1793_v26  ;;  %v836_v6 = vadd.f32 (!%p2102_p11), %v833_v3, %v832_v2 }
 0x6d1   : > { %v835_v5 = vmul.f32 %v831_v1, %v831_v1 }
 0x6d2   : > { %v834_v4 = vmul.f32 %v830_v0, %v830_v0 }
 0x6d4   : > { %v837_v7 = vadd.f32 %v836_v6, %v834_v4 }
 0x6d6   : > { %v838_v8 = vadd.f32 %v837_v7, %v835_v5 }
 0x6d8   : > { %839 = vadd.xlane.f32.xlu0 %v838_v8 }
 0x765   : > { %v840_v10 = vpop.xlane.xlu0 %839 }
 0x766   : > { %v841_v11 = vrot.slane %v840_v10, 4 }
 0x768   : > { %v842_v12 = vadd.f32 %v841_v11, %v840_v10 }
 0x76a   : > { %v843_v13 = vrot.slane %v842_v12, 2 }
 0x76c   : > { %v844_v14 = vadd.f32 %v843_v13, %v842_v12 }
 0x76e   : > { %v845_v15 = vrot.slane %v844_v14, 1 }
 0x770   : > { %v846_v16 = vadd.f32 %v845_v15, %v844_v14 }
 0x772   : > { %1271 = vpush %v846_v16 }
 0x7a3   : > { %s1272_s12 = spop %1271 }
 0x7a4   : > { %v848_v17 = vstv %s1272_s12 }
 0x7a5   : > { %849 = vst [vmem:[%s1952_s26] sm:$0xff] %v848_v17 }
 0x7a6 PF: > { %p1076_p0 = scmp.ne.s32.totalorder %s1608_s25, 1 }
 0x7a7   : > { %v854_v18 = vlaneseq (!%p1076_p0)  ;;  %s1077_s13 = sshll.u32 (!%p1076_p0), %s1608_s25, 5  ;;  %v877_v21 = vsub.f32 (!%p1076_p0), %v802_v57, %v1786_v9  ;;  %v878_v29 = vsub.f32 (!%p1076_p0), %v1939_v55, %v1790_v25  ;;  %v879_v30 = vsub.f32 (!%p1076_p0), %v812_v61, %v1793_v26 }
 0x7a8   : > { %853 = sbr.rel (%p1076_p0) target bundleno = 2185 (0x889), region = 60  ;;  %v860_v19 = vstv (!%p1076_p0), %s1077_s13  ;;  %v880_v31 = vsub.f32 (!%p1076_p0), %v817_v59, %v1798_v27  ;;  %v1547_v35 = vmov (!%p1076_p0), 0.0  }
 0x7a9   : > { %v855_v20 = vshrl.u32 (!%p1076_p0), %v854_v18, 7 }
 0x7ab   : > { %v856_v22 = vadd.s32 (!%p1076_p0), 8, %v855_v20  ;;  %v857_v23 = vadd.s32 (!%p1076_p0), 16, %v855_v20  ;;  %v858_v24 = vadd.s32 (!%p1076_p0), 24, %v855_v20  ;;  %v861_v28 = vadd.s32 (!%p1076_p0), %v860_v19, %v855_v20 }
 0x7ad   : > { %v862_v32 = vadd.s32 (!%p1076_p0), %v860_v19, %v856_v22  ;;  %v863_v33 = vadd.s32 (!%p1076_p0), %v860_v19, %v857_v23  ;;  %v864_v34 = vadd.s32 (!%p1076_p0), %v860_v19, %v858_v24  ;;  %vm865_vm0 = vcmp.lt.s32.totalorder (!%p1076_p0), %v861_v28, 50 }
 0x7ae   : > { %v1078_v36 = vsel (!%p1076_p0), %vm865_vm0, 1.0, %v1547_v35 }
 0x7af   : > { %vm866_vm1 = vcmp.lt.s32.totalorder %v862_v32, 50  ;;  %vm867_vm2 = vcmp.lt.s32.totalorder %v863_v33, 50  ;;  %vm868_vm3 = vcmp.lt.s32.totalorder %v864_v34, 50  ;;  %v881_v9 = vmul.f32 %v1078_v36, %v877_v21 }
 0x7b0   : > { %v1079_v37 = vsel %vm866_vm1, 1.0, %v1547_v35  ;;  %v1080_v38 = vsel %vm867_vm2, 1.0, %v1547_v35  ;;  %v1081_v39 = vsel %vm868_vm3, 1.0, %v1547_v35 }
 0x7b1   : > { %v882_v40 = vmul.f32 %v1079_v37, %v878_v29  ;;  %v883_v41 = vmul.f32 %v1080_v38, %v879_v30  ;;  %v884_v25 = vmul.f32 %v1081_v39, %v880_v31  ;;  %v885_v42 = vmul.f32 %v881_v9, %v881_v9 }
 0x7b3   : > { %v886_v26 = vmul.f32 %v882_v40, %v882_v40  ;;  %v887_v43 = vmul.f32 %v883_v41, %v883_v41  ;;  %v888_v27 = vmul.f32 %v884_v25, %v884_v25 }
 0x7b5   : > { %v889_v44 = vadd.f32 %v886_v26, %v885_v42 }
 0x7b7   : > { %v890_v45 = vadd.f32 %v889_v44, %v887_v43 }
 0x7b9   : > { %v891_v46 = vadd.f32 %v890_v45, %v888_v27 }
 0x7bb   : > { %892 = vadd.xlane.f32.xlu0 %v891_v46 }
 0x848   : > { %v893_v47 = vpop.xlane.xlu0 %892 }
 0x849   : > { %v894_v48 = vrot.slane %v893_v47, 4 }
 0x84b   : > { %v895_v49 = vadd.f32 %v894_v48, %v893_v47 }
 0x84d   : > { %v896_v50 = vrot.slane %v895_v49, 2 }
 0x84f   : > { %v897_v51 = vadd.f32 %v896_v50, %v895_v49 }
 0x851   : > { %v898_v52 = vrot.slane %v897_v51, 1 }
 0x853   : > { %v899_v53 = vadd.f32 %v898_v52, %v897_v51 }
 0x855   : > { %1273 = vpush %v899_v53 }
 0x886   : > { %s1274_s10 = spop %1273 }
 0x887   : > { %v901_v54 = vstv %s1274_s10 }
 0x888   : > { %902 = vst [vmem:[%s1952_s26] sm:$0xff] %v901_v54 }
 0x889 PF: > { %s1090_s15 = sshll.u32 %s1608_s25, 9  ;;  %s922_s29 = sshll.u32 %s1943_s17, 4  ;;  %s1977_s29 = int_to_ptr.vmem [resolvable:$true] %s922_s29 }
 0x88a   : > { %s1974_s18 = scalar_lea.hbm %s2051_s5, %s1090_s15  ;;  %s904_s27 = scalar_lea.sflag [#allocation4], %s1768_s30 }
 0x88b   : > { %s1438_s19 = scalar_lea.vmem %s1977_s29, 512  ;;  %p2103_p3 = scmp.ne.s32.totalorder %s2064_s9, 0 }
 0x88c   : > { %p1439_p2 = scmp.ne.s32.totalorder %s1977_s29, %s1438_s19  ;;  %s1548_s20 = smov [#allocation8]  }
 0x88d   : > { %s1442_s16 = sshll.u32 %s1548_s20, 4  ;;  %s1443_s16 = int_to_ptr.vmem [resolvable:$false] %s1442_s16 }
 0x88e   : > { %p1440_p7 = pnand %p1439_p2, %p2103_p3  ;;  %s1444_s12 = scalar_lea.vmem %s1443_s16, 1024 }
 0x88f   : > { %p1445_p12 = scmp.lt.s32.totalorder %s1977_s29, %s1443_s16  ;;  %p1446_p1 = scmp.lt.s32.totalorder %s1444_s12, %s1438_s19 }
 0x890   : > { %p1441_p9 = pneg %p1440_p7 }
 0x891   : > { %p1447_p13 = por %p1446_p1, %p1445_p12 }
 0x893   : > { %p1448_p6 = pnand %p1447_p13, %p1441_p9 }
 0x895   : > { %1451 = shalt.err (!%p1448_p6)
}
 0x896   : > { %s1452_s17 = scalar_lea.hbm %s1974_s18, 512  ;;  %s1456_s15 = scalar_lea.hbm %s2051_s5, 1024 }
 0x897   : > { %p1453_p10 = scmp.ne.s32.totalorder %s1974_s18, %s1452_s17  ;;  %p1457_p8 = scmp.lt.u32.totalorder %s1974_s18, %s2051_s5 }
 0x898   : > { %p1458_p11 = scmp.lt.u32.totalorder %s1456_s15, %s1452_s17  ;;  %p1460_p2 = scmp.lt.u32.totalorder %s1452_s17, %s1974_s18 }
 0x899   : > { %p1454_p4 = pnand %p1453_p10, %p2103_p3 }
 0x89a   : > { %p1459_p0 = por %p1458_p11, %p1457_p8 }
 0x89b   : > { %p1455_p5 = pneg %p1454_p4 }
 0x89c   : > { %p1461_p7 = por %p1460_p2, %p1459_p0 }
 0x89e   : > { %p1462_p9 = pnand %p1461_p7, %p1455_p5 }
 0x8a0   : > { %1465 = shalt.err (!%p1462_p9)
}
 0x8a1   : > { %s1549_s19 = smov 128   ;;  %s1550_s20 = smov 8  }
 0x8a2   : > { %1285 = dma.vmem_to_hbm [thread:$0]  (%p2103_p3), %s1977_s29, 512, %s1974_s18, %s904_s27, %s1549_s19, %s1549_s19, %s1550_s20  }
 0x8a3   : > { %s1086_s16 = sshll.u32 %s1608_s25, 7  ;;  %s938_s12 = sshll.u32 %s1952_s26, 4  ;;  %s939_s12 = int_to_ptr.vmem [resolvable:$true] %s938_s12 }
 0x8a4   : > { %s2008_s10 = scalar_lea.hbm %s2052_s6, %s1086_s16  ;;  %s909_s15 = scalar_lea.sflag [#allocation10], %s1768_s30 }
 0x8a5   : > { %s1466_s14 = scalar_lea.vmem %s939_s12, 128  ;;  %s1551_s7 = smov [#allocation9]  }
 0x8a6   : > { %p1467_p12 = scmp.ne.s32.totalorder %s939_s12, %s1466_s14  ;;  %s1470_s0 = sshll.u32 %s1551_s7, 4  ;;  %s1471_s0 = int_to_ptr.vmem [resolvable:$false] %s1470_s0 }
 0x8a7   : > { %s1472_s1 = scalar_lea.vmem %s1471_s0, 256  ;;  %p1473_p6 = scmp.lt.s32.totalorder %s939_s12, %s1471_s0 }
 0x8a8   : > { %p1468_p1 = pnand %p1467_p12, %p2103_p3  ;;  %p1474_p10 = scmp.lt.s32.totalorder %s1472_s1, %s1466_s14 }
 0x8aa   : > { %p1469_p13 = pneg %p1468_p1  ;;  %p1475_p4 = por %p1474_p10, %p1473_p6 }
 0x8ac   : > { %p1476_p5 = pnand %p1475_p4, %p1469_p13 }
 0x8ae   : > { %1479 = shalt.err (!%p1476_p5)
}
 0x8af   : > { %s1480_s25 = scalar_lea.hbm %s2008_s10, 128  ;;  %s1484_s18 = scalar_lea.hbm %s2052_s6, 256 }
 0x8b0   : > { %p1481_p8 = scmp.ne.s32.totalorder %s2008_s10, %s1480_s25  ;;  %p1485_p2 = scmp.lt.u32.totalorder %s2008_s10, %s2052_s6 }
 0x8b1   : > { %p1486_p7 = scmp.lt.u32.totalorder %s1484_s18, %s1480_s25  ;;  %p1488_p12 = scmp.lt.u32.totalorder %s1480_s25, %s2008_s10 }
 0x8b2   : > { %p1482_p11 = pnand %p1481_p8, %p2103_p3 }
 0x8b3   : > { %p1487_p9 = por %p1486_p7, %p1485_p2 }
 0x8b4   : > { %p1483_p0 = pneg %p1482_p11 }
 0x8b5   : > { %p1489_p1 = por %p1488_p12, %p1487_p9 }
 0x8b7   : > { %p1490_p13 = pnand %p1489_p1, %p1483_p0 }
 0x8b9   : > { %1493 = shalt.err (!%p1490_p13)
}
 0x8ba   : > { %1286 = dma.vmem_to_hbm [thread:$0]  (%p2103_p3), %s939_s12, 128, %s2008_s10, %s909_s15  }
 0x8bb PF: > { %s950_s1 = sand.u32 1, %s1528_s21   ;;  %p2104_p6 = scmp.ne.s32.totalorder %s2059_s28, 0 }
 0x8bc   : > { %p2105_p10 = scmp.ge.s32.totalorder %s1540_s24, 2  ;;  %s951_s27 = scalar_lea.sflag [#allocation4], %s950_s1 }
 0x8be   : > { %p1301_p4 = pnand %p2105_p10, %p2104_p6 }
 0x8c0   : > { %1519 = dma.done.wait (!%p1301_p4), %s951_s27, 512  }
 0x8c1   : > { %1521 = vsyncadd (!%p1301_p4), %s951_s27, 4294966784  ;;  %s960_s19 = scalar_lea.sflag [#allocation10], %s950_s1 }
 0x8c2   : > { %1523 = dma.done.wait (!%p1301_p4), %s960_s19, 128  }
 0x8c3   : > { %1525 = vsyncadd (!%p1301_p4), %s960_s19, 4294967168  ;;  %p24_p3 = scmp.ge.s32.totalorder %s1703_s8, 4   ;;  %s2106_s21 = smov %s1532_s22 }
 0x8c4   : > { %s2107_s22 = smov %s1536_s23  ;;  %s2108_s23 = smov %s1719_s11 }
 0x8c5   : > { %s2109_s24 = smov %s1703_s8  ;;  %26 = sbr.rel (!%p24_p3) target bundleno = 11 (0xb), region = 118 }
 0x8cc   :  { %965 = vsyncpa [#allocation3], 1 }
 0x8cd   :  { %967 = vsyncpa [#allocation3 + $0x1], 1 }
 0x8ce   :  { %968 = vsyncpa [#allocation6], 1 }
 0x8cf   :  { %969 = vsyncpa [#allocation4], 1 }
 0x8d0   :  { %971 = vsyncpa [#allocation4 + $0x1], 1 }
 0x8d1   :  { %972 = vsyncpa [#allocation10], 1 }
 0x8d2   :  { %974 = vsyncpa [#allocation10 + $0x1], 1 }

</bundles_post_ra>
